<compile_context>
chip_gen: v7x
topology: tpu7x:2x2x1
jax: 0.10.0
libtpu: 0.0.40
codegen_flags: <defaults>
</compile_context>

<pallas_src>
import jax
import jax.numpy as jnp
from jax.experimental import pallas as pl
from jax.experimental.pallas import tpu as pltpu

LANE = 128     # lane-dense padded output width
NEG = -1e30    # logit pad value -> exp() underflows to 0 in log_softmax


# ----------------------------------------------------------------------------
# Pallas kernel: one graph mini-batch per grid step (5 matmuls + relu + log_softmax)
# ----------------------------------------------------------------------------
def simple_gcn_net_kernel(a_ref, x_ref, w1_ref, b1_ref, w2_ref, b2_ref,
                          p_ref, fw_ref, fb_ref, o_ref):
    a = a_ref[...]                      # (N, N)  bf16 normalized adjacency
    x = x_ref[...]                      # (N, F)  bf16 node features

    # ---- GCNConv 1 (re-associated, F < H): (A @ X) @ W1 + b1, ReLU ----
    ax = jnp.dot(a, x, preferred_element_type=jnp.float32)
    h = jnp.dot(ax.astype(jnp.bfloat16), w1_ref[...],
                preferred_element_type=jnp.float32) + b1_ref[...]
    h = jnp.maximum(h, 0.0)

    # ---- Dropout (eval mode -> identity) ----
    # TODO(synk): training-mode dropout would need in-kernel PRNG masks
    #             (pltpu.prng_seed + pltpu.stateful_bernoulli).

    # ---- GCNConv 2 (A-last, out < hid): A @ (H @ W2) + b2, ReLU ----
    hw = jnp.dot(h.astype(jnp.bfloat16), w2_ref[...],
                 preferred_element_type=jnp.float32)
    h2 = jnp.dot(a, hw.astype(jnp.bfloat16),
                 preferred_element_type=jnp.float32) + b2_ref[...]
    h2 = jnp.maximum(h2, 0.0)

    # ---- scatter_mean pooling: P @ H (rows beyond num_graphs are zero pad) ----
    g = jnp.dot(p_ref[...], h2.astype(jnp.bfloat16),
                preferred_element_type=jnp.float32)          # (Bp, out_feats)

    # ---- fc1 + fc2 folded into one affine (no nonlinearity between them) ----
    # fw is padded to 128 lanes with zeros; fb padded lanes hold NEG.
    y = jnp.dot(g.astype(jnp.bfloat16), fw_ref[...],
                preferred_element_type=jnp.float32) + fb_ref[...]   # (Bp, 128)

    # ---- log_softmax along dim=1 (padded lanes contribute exp(NEG) ~= 0) ----
    m = jnp.max(y, axis=1, keepdims=True)
    z = y - m
    lse = jnp.log(jnp.sum(jnp.exp(z), axis=1, keepdims=True))
    o_ref[...] = z - lse


# ----------------------------------------------------------------------------
# Wrapper: one pallas_call over a parallel grid of independent mini-batches
# ----------------------------------------------------------------------------
def simple_gcn_net_forward(a_hat, x, w1, b1, w2, b2, pool, fw1, fb1, fw2, fb2):
    """a_hat: (G,N,N), x: (G,N,F), pool: (G,Bp,N). Returns (G,Bp,LANE) padded
    log-probs; caller slices [:, :num_graphs, :D_out]."""
    G, N, F = x.shape
    Bp = pool.shape[1]
    O = w2.shape[1]
    D_out = fw2.shape[1]

    # Fold fc1/fc2 (reference applies them back-to-back with no ReLU).
    fw = fw1 @ fw2                                  # (O, D_out)
    fb = fb1 @ fw2 + fb2                            # (1, D_out)
    fw_pad = jnp.zeros((O, LANE), jnp.float32).at[:, :D_out].set(fw)
    fb_pad = jnp.full((1, LANE), NEG, jnp.float32).at[:, :D_out].set(fb)

    # bf16 for streamed matmul operands; biases stay f32 (f32 accumulation on dots).
    bf = jnp.bfloat16
    a_hat = a_hat.astype(bf)
    x = x.astype(bf)
    pool = pool.astype(bf)
    w1_b = w1.astype(bf)
    w2_b = w2.astype(bf)
    fw_pad = fw_pad.astype(bf)

    def batched(shape):
        # per-mini-batch block: leading grid dim squeezed out of the kernel Ref
        return pl.BlockSpec((None,) + shape, lambda g: (g, 0, 0))

    def shared(arr):
        # grid-invariant parameter: constant block index => single DMA, reused
        nd = arr.ndim
        return pl.BlockSpec(arr.shape, lambda g: (0,) * nd)

    return pl.pallas_call(
        simple_gcn_net_kernel,
        out_shape=jax.ShapeDtypeStruct((G, Bp, LANE), jnp.float32),
        grid=(G,),
        in_specs=[
            batched((N, N)),            # a_hat  (per mini-batch)
            batched((N, F)),            # x      (per mini-batch)
            shared(w1_b), shared(b1),   # conv1 params (grid-invariant)
            shared(w2_b), shared(b2),   # conv2 params
            batched((Bp, N)),           # pool   (per mini-batch)
            shared(fw_pad), shared(fb_pad),   # fused fc params
        ],
        out_specs=batched((Bp, LANE)),
        compiler_params=pltpu.CompilerParams(
            dimension_semantics=("parallel",)),
    )(a_hat, x, w1_b, b1, w2_b, b2, pool, fw_pad, fb_pad)


# ----------------------------------------------------------------------------
# Glue: dense GCN propagation matrix and mean-pool matrix (plain JAX, outside kernel)
# TODO(synk): for large sparse graphs, replace dense A_hat with a scalar-prefetched
#             CSR-style gather design (PrefetchScalarGridSpec) and tile A @ H.
# ----------------------------------------------------------------------------
def build_gcn_adj(edge_index, num_nodes):
    """PyG GCNConv normalization: add self loops, D^-1/2 (A+I) D^-1/2."""
    src = jnp.concatenate([edge_index[0], jnp.arange(num_nodes)])
    dst = jnp.concatenate([edge_index[1], jnp.arange(num_nodes)])
    deg = jnp.zeros((num_nodes,), jnp.float32).at[dst].add(1.0)
    dinv = jnp.where(deg > 0, 1.0 / jnp.sqrt(deg), 0.0)
    norm = dinv[src] * dinv[dst]
    return jnp.zeros((num_nodes, num_nodes), jnp.float32).at[dst, src].add(norm)


def build_mean_pool(batch, num_rows):
    """scatter_mean as a dense (num_rows, N) matrix; rows >= num_graphs are zero."""
    onehot = (batch[None, :] == jnp.arange(num_rows)[:, None]).astype(jnp.float32)
    counts = jnp.maximum(onehot.sum(axis=1, keepdims=True), 1.0)
    return onehot / counts


# ----------------------------------------------------------------------------
# Main
# ----------------------------------------------------------------------------
if __name__ == "__main__":
    # Model dims: SimpleGCNNet(in_feats, hid_feats, out_feats, D_H, D_out)
    in_feats, hid_feats, out_feats, D_H, D_out = 8, 32, 16, 32, 4
    num_nodes, num_edges, num_graphs = 16, 40, 4
    num_batches = 4        # independent graph mini-batches -> parallel grid axis
    B_pad = 8              # pad graph-row dim to a sublane multiple

    key = jax.random.PRNGKey(0)
    k_param, k_data = jax.random.split(key)
    pk = jax.random.split(k_param, 6)

    # Shared parameters (synthetic, deterministic)
    w1 = jax.random.normal(pk[0], (in_feats, hid_feats), jnp.float32) * 0.1
    b1 = jnp.zeros((1, hid_feats), jnp.float32)
    w2 = jax.random.normal(pk[1], (hid_feats, out_feats), jnp.float32) * 0.1
    b2 = jnp.zeros((1, out_feats), jnp.float32)
    fw1 = jax.random.normal(pk[2], (out_feats, D_H), jnp.float32) * 0.1
    fb1 = jax.random.normal(pk[3], (1, D_H), jnp.float32) * 0.01
    fw2 = jax.random.normal(pk[4], (D_H, D_out), jnp.float32) * 0.1
    fb2 = jax.random.normal(pk[5], (1, D_out), jnp.float32) * 0.01

    # Per-mini-batch synthetic graphs
    a_list, x_list, p_list = [], [], []
    for dk in jax.random.split(k_data, num_batches):
        dk0, dk1, dk2 = jax.random.split(dk, 3)
        x_i = jax.random.normal(dk0, (num_nodes, in_feats), jnp.float32)
        edge_index = jax.random.randint(dk1, (2, num_edges), 0, num_nodes, jnp.int32)
        batch = jnp.sort(jax.random.randint(dk2, (num_nodes,), 0, num_graphs, jnp.int32))
        a_list.append(build_gcn_adj(edge_index, num_nodes))
        x_list.append(x_i)
        p_list.append(build_mean_pool(batch, B_pad))
    a_hat = jnp.stack(a_list)      # (G, N, N)
    xs = jnp.stack(x_list)         # (G, N, F)
    pools = jnp.stack(p_list)      # (G, B_pad, N)

    out_pad = simple_gcn_net_forward(a_hat, xs, w1, b1, w2, b2, pools,
                                     fw1, fb1, fw2, fb2)
    out_pad = jax.block_until_ready(out_pad)
    out = out_pad[:, :num_graphs, :D_out]          # strip row/lane padding

    # Pure-JAX f32 reference of the module forward (eval mode)
    def ref_one(a, x, p):
        h = jnp.maximum(a @ (x @ w1) + b1, 0.0)
        h = jnp.maximum(a @ (h @ w2) + b2, 0.0)
        g = p @ h
        y = (g @ fw1 + fb1) @ fw2 + fb2
        return jax.nn.log_softmax(y, axis=1)

    ref = jnp.stack([ref_one(a_list[i], x_list[i], p_list[i][:num_graphs])
                     for i in range(num_batches)])

    assert out.shape == (num_batches, num_graphs, D_out)
    assert bool(jnp.all(jnp.isfinite(out)))
    # log_softmax rows sum to 1 in prob space (padded lanes contribute ~0)
    assert jnp.allclose(jnp.exp(out).sum(axis=-1), 1.0, atol=1e-4)
    # bf16 operands / f32 accumulation vs f32 reference
    assert jnp.allclose(out, ref, atol=5e-2), float(jnp.max(jnp.abs(out - ref)))
    print("KERNEL_OK")
</pallas_src>

<mosaic_0001>
module attributes {stable_mosaic.version = 11 : i64} {
  func.func @simple_gcn_net_kernel(%arg0: i32, %arg1: memref<1x16x16xbf16, #tpu.memory_space<vmem>>, %arg2: memref<1x16x8xbf16, #tpu.memory_space<vmem>>, %arg3: memref<8x32xbf16, #tpu.memory_space<vmem>>, %arg4: memref<1x32xf32, #tpu.memory_space<vmem>>, %arg5: memref<32x16xbf16, #tpu.memory_space<vmem>>, %arg6: memref<1x16xf32, #tpu.memory_space<vmem>>, %arg7: memref<1x8x16xbf16, #tpu.memory_space<vmem>>, %arg8: memref<16x128xbf16, #tpu.memory_space<vmem>>, %arg9: memref<1x128xf32, #tpu.memory_space<vmem>>, %arg10: memref<1x8x128xf32, #tpu.memory_space<vmem>>) attributes {dimension_semantics = [#tpu.dimension_semantics<parallel>], iteration_bounds = array<i64: 4>, scalar_prefetch = 0 : i64, scratch_operands = 0 : i64, tpu.core_type = #tpu.core_type<tc>, window_params = [{transform_indices = @transform_0, window_bounds = array<i64: 1, 16, 16>}, {transform_indices = @transform_1, window_bounds = array<i64: 1, 16, 8>}, {pipeline_mode = #tpu.pipeline_mode<synchronous>, transform_indices = @transform_2, window_bounds = array<i64: 8, 32>}, {pipeline_mode = #tpu.pipeline_mode<synchronous>, transform_indices = @transform_3, window_bounds = array<i64: 1, 32>}, {pipeline_mode = #tpu.pipeline_mode<synchronous>, transform_indices = @transform_4, window_bounds = array<i64: 32, 16>}, {pipeline_mode = #tpu.pipeline_mode<synchronous>, transform_indices = @transform_5, window_bounds = array<i64: 1, 16>}, {transform_indices = @transform_6, window_bounds = array<i64: 1, 8, 16>}, {pipeline_mode = #tpu.pipeline_mode<synchronous>, transform_indices = @transform_7, window_bounds = array<i64: 16, 128>}, {pipeline_mode = #tpu.pipeline_mode<synchronous>, transform_indices = @transform_8, window_bounds = array<i64: 1, 128>}, {transform_indices = @transform_9, window_bounds = array<i64: 1, 8, 128>}]} {
    %c0 = arith.constant 0 : index
    %c0_0 = arith.constant 0 : index
    %c0_1 = arith.constant 0 : index
    %0 = vector.load %arg1[%c0, %c0_0, %c0_1] : memref<1x16x16xbf16, #tpu.memory_space<vmem>>, vector<1x16x16xbf16>
    %1 = vector.shape_cast %0 : vector<1x16x16xbf16> to vector<16x16xbf16>
    %c0_2 = arith.constant 0 : index
    %c0_3 = arith.constant 0 : index
    %c0_4 = arith.constant 0 : index
    %2 = vector.load %arg2[%c0_2, %c0_3, %c0_4] : memref<1x16x8xbf16, #tpu.memory_space<vmem>>, vector<1x16x8xbf16>
    %3 = vector.shape_cast %2 : vector<1x16x8xbf16> to vector<16x8xbf16>
    %cst = arith.constant dense<0.000000e+00> : vector<16x8xf32>
    %4 = tpu.matmul %1, %3, %cst {dimension_numbers = #tpu.dot_dimension_numbers<[1], [0], [0], [1], [0, 0, 1, 1], [], []>} : vector<16x16xbf16>, vector<16x8xbf16>, vector<16x8xf32> -> vector<16x8xf32>
    %5 = arith.truncf %4 : vector<16x8xf32> to vector<16x8xbf16>
    %c0_5 = arith.constant 0 : index
    %c0_6 = arith.constant 0 : index
    %6 = vector.load %arg3[%c0_5, %c0_6] : memref<8x32xbf16, #tpu.memory_space<vmem>>, vector<8x32xbf16>
    %cst_7 = arith.constant dense<0.000000e+00> : vector<16x32xf32>
    %7 = tpu.matmul %5, %6, %cst_7 {dimension_numbers = #tpu.dot_dimension_numbers<[1], [0], [0], [1], [0, 0, 1, 1], [], []>} : vector<16x8xbf16>, vector<8x32xbf16>, vector<16x32xf32> -> vector<16x32xf32>
    %c0_8 = arith.constant 0 : index
    %c0_9 = arith.constant 0 : index
    %8 = vector.load %arg4[%c0_8, %c0_9] : memref<1x32xf32, #tpu.memory_space<vmem>>, vector<1x32xf32>
    %9 = vector.broadcast %8 : vector<1x32xf32> to vector<16x32xf32>
    %10 = arith.addf %7, %9 : vector<16x32xf32>
    %cst_10 = arith.constant 0.000000e+00 : f32
    %11 = vector.broadcast %cst_10 : f32 to vector<16x32xf32>
    %12 = arith.maximumf %10, %11 : vector<16x32xf32>
    %13 = arith.truncf %12 : vector<16x32xf32> to vector<16x32xbf16>
    %c0_11 = arith.constant 0 : index
    %c0_12 = arith.constant 0 : index
    %14 = vector.load %arg5[%c0_11, %c0_12] : memref<32x16xbf16, #tpu.memory_space<vmem>>, vector<32x16xbf16>
    %cst_13 = arith.constant dense<0.000000e+00> : vector<16x16xf32>
    %15 = tpu.matmul %13, %14, %cst_13 {dimension_numbers = #tpu.dot_dimension_numbers<[1], [0], [0], [1], [0, 0, 1, 1], [], []>} : vector<16x32xbf16>, vector<32x16xbf16>, vector<16x16xf32> -> vector<16x16xf32>
    %16 = arith.truncf %15 : vector<16x16xf32> to vector<16x16xbf16>
    %cst_14 = arith.constant dense<0.000000e+00> : vector<16x16xf32>
    %17 = tpu.matmul %1, %16, %cst_14 {dimension_numbers = #tpu.dot_dimension_numbers<[1], [0], [0], [1], [0, 0, 1, 1], [], []>} : vector<16x16xbf16>, vector<16x16xbf16>, vector<16x16xf32> -> vector<16x16xf32>
    %c0_15 = arith.constant 0 : index
    %c0_16 = arith.constant 0 : index
    %18 = vector.load %arg6[%c0_15, %c0_16] : memref<1x16xf32, #tpu.memory_space<vmem>>, vector<1x16xf32>
    %19 = vector.broadcast %18 : vector<1x16xf32> to vector<16x16xf32>
    %20 = arith.addf %17, %19 : vector<16x16xf32>
    %cst_17 = arith.constant 0.000000e+00 : f32
    %21 = vector.broadcast %cst_17 : f32 to vector<16x16xf32>
    %22 = arith.maximumf %20, %21 : vector<16x16xf32>
    %c0_18 = arith.constant 0 : index
    %c0_19 = arith.constant 0 : index
    %c0_20 = arith.constant 0 : index
    %23 = vector.load %arg7[%c0_18, %c0_19, %c0_20] : memref<1x8x16xbf16, #tpu.memory_space<vmem>>, vector<1x8x16xbf16>
    %24 = vector.shape_cast %23 : vector<1x8x16xbf16> to vector<8x16xbf16>
    %25 = arith.truncf %22 : vector<16x16xf32> to vector<16x16xbf16>
    %cst_21 = arith.constant dense<0.000000e+00> : vector<8x16xf32>
    %26 = tpu.matmul %24, %25, %cst_21 {dimension_numbers = #tpu.dot_dimension_numbers<[1], [0], [0], [1], [0, 0, 1, 1], [], []>} : vector<8x16xbf16>, vector<16x16xbf16>, vector<8x16xf32> -> vector<8x16xf32>
    %27 = arith.truncf %26 : vector<8x16xf32> to vector<8x16xbf16>
    %c0_22 = arith.constant 0 : index
    %c0_23 = arith.constant 0 : index
    %28 = vector.load %arg8[%c0_22, %c0_23] : memref<16x128xbf16, #tpu.memory_space<vmem>>, vector<16x128xbf16>
    %cst_24 = arith.constant dense<0.000000e+00> : vector<8x128xf32>
    %29 = tpu.matmul %27, %28, %cst_24 {dimension_numbers = #tpu.dot_dimension_numbers<[1], [0], [0], [1], [0, 0, 1, 1], [], []>} : vector<8x16xbf16>, vector<16x128xbf16>, vector<8x128xf32> -> vector<8x128xf32>
    %c0_25 = arith.constant 0 : index
    %c0_26 = arith.constant 0 : index
    %30 = vector.load %arg9[%c0_25, %c0_26] : memref<1x128xf32, #tpu.memory_space<vmem>>, vector<1x128xf32>
    %31 = vector.broadcast %30 : vector<1x128xf32> to vector<8x128xf32>
    %32 = arith.addf %29, %31 : vector<8x128xf32>
    %cst_27 = arith.constant dense<0xFF800000> : vector<8xf32>
    %33 = vector.multi_reduction <maximumf>, %32, %cst_27 [1] : vector<8x128xf32> to vector<8xf32>
    %34 = vector.shape_cast %33 : vector<8xf32> to vector<8x1xf32>
    %35 = vector.broadcast %34 : vector<8x1xf32> to vector<8x128xf32>
    %36 = arith.subf %32, %35 : vector<8x128xf32>
    %37 = math.exp %36 : vector<8x128xf32>
    %cst_28 = arith.constant dense<0.000000e+00> : vector<8xf32>
    %38 = vector.multi_reduction <add>, %37, %cst_28 [1] : vector<8x128xf32> to vector<8xf32>
    %39 = vector.shape_cast %38 : vector<8xf32> to vector<8x1xf32>
    %40 = math.log %39 : vector<8x1xf32>
    %41 = vector.broadcast %40 : vector<8x1xf32> to vector<8x128xf32>
    %42 = arith.subf %36, %41 : vector<8x128xf32>
    %c0_29 = arith.constant 0 : index
    %c0_30 = arith.constant 0 : index
    %c0_31 = arith.constant 0 : index
    %43 = vector.load %arg10[%c0_29, %c0_30, %c0_31] : memref<1x8x128xf32, #tpu.memory_space<vmem>>, vector<1x8x128xf32>
    %44 = vector.shape_cast %43 : vector<1x8x128xf32> to vector<8x128xf32>
    %45 = vector.shape_cast %42 : vector<8x128xf32> to vector<1x8x128xf32>
    tpu.vector_store %arg10[%c0_29, %c0_30, %c0_31], %45 {strides = array<i32>} : memref<1x8x128xf32, #tpu.memory_space<vmem>>, vector<1x8x128xf32>,
    return
  }
  func.func @transform_0(%arg0: i32) -> (i32, i32, i32) {
    %c0_i32 = arith.constant 0 : i32
    %c0_i32_0 = arith.constant 0 : i32
    %c0_i32_1 = arith.constant 0 : i32
    return %arg0, %c0_i32, %c0_i32_0 : i32, i32, i32
  }
  func.func @transform_1(%arg0: i32) -> (i32, i32, i32) {
    %c0_i32 = arith.constant 0 : i32
    %c0_i32_0 = arith.constant 0 : i32
    %c0_i32_1 = arith.constant 0 : i32
    return %arg0, %c0_i32, %c0_i32_0 : i32, i32, i32
  }
  func.func @transform_2(%arg0: i32) -> (i32, i32) {
    %c0_i32 = arith.constant 0 : i32
    %c0_i32_0 = arith.constant 0 : i32
    %c0_i32_1 = arith.constant 0 : i32
    return %c0_i32, %c0_i32_0 : i32, i32
  }
  func.func @transform_3(%arg0: i32) -> (i32, i32) {
    %c0_i32 = arith.constant 0 : i32
    %c0_i32_0 = arith.constant 0 : i32
    %c0_i32_1 = arith.constant 0 : i32
    return %c0_i32, %c0_i32_0 : i32, i32
  }
  func.func @transform_4(%arg0: i32) -> (i32, i32) {
    %c0_i32 = arith.constant 0 : i32
    %c0_i32_0 = arith.constant 0 : i32
    %c0_i32_1 = arith.constant 0 : i32
    return %c0_i32, %c0_i32_0 : i32, i32
  }
  func.func @transform_5(%arg0: i32) -> (i32, i32) {
    %c0_i32 = arith.constant 0 : i32
    %c0_i32_0 = arith.constant 0 : i32
    %c0_i32_1 = arith.constant 0 : i32
    return %c0_i32, %c0_i32_0 : i32, i32
  }
  func.func @transform_6(%arg0: i32) -> (i32, i32, i32) {
    %c0_i32 = arith.constant 0 : i32
    %c0_i32_0 = arith.constant 0 : i32
    %c0_i32_1 = arith.constant 0 : i32
    return %arg0, %c0_i32, %c0_i32_0 : i32, i32, i32
  }
  func.func @transform_7(%arg0: i32) -> (i32, i32) {
    %c0_i32 = arith.constant 0 : i32
    %c0_i32_0 = arith.constant 0 : i32
    %c0_i32_1 = arith.constant 0 : i32
    return %c0_i32, %c0_i32_0 : i32, i32
  }
  func.func @transform_8(%arg0: i32) -> (i32, i32) {
    %c0_i32 = arith.constant 0 : i32
    %c0_i32_0 = arith.constant 0 : i32
    %c0_i32_1 = arith.constant 0 : i32
    return %c0_i32, %c0_i32_0 : i32, i32
  }
  func.func @transform_9(%arg0: i32) -> (i32, i32, i32) {
    %c0_i32 = arith.constant 0 : i32
    %c0_i32_0 = arith.constant 0 : i32
    %c0_i32_1 = arith.constant 0 : i32
    return %arg0, %c0_i32, %c0_i32_0 : i32, i32, i32
  }
}

</mosaic_0001>

<bundles_post_ra>
// kernel: tpu_custom_call.1
= control target key start
LH: loop header
LB: loop body
LE: loop exit
PB: predicated region body
PF: predicated region fallthrough
CT: control target
= control target key end

     0   :  { %14 = vsyncpa [#allocation3], 0  ;;  %s1203_s0 = inlined_call_operand.vmem [shape: bf16[4,16,16], index: 0, kind: input, shape index: {}]   ;;  %s1204_s1 = inlined_call_operand.vmem [shape: bf16[4,16,8], index: 1, kind: input, shape index: {}]   ;;  %s1205_s2 = inlined_call_operand.vmem [shape: bf16[8,32], index: 2, kind: input, shape index: {}]   ;;  %s1206_s3 = inlined_call_operand.vmem [shape: f32[1,32], index: 3, kind: input, shape index: {}]   ;;  %s1207_s4 = inlined_call_operand.vmem [shape: bf16[32,16], index: 4, kind: input, shape index: {}]   ;;  %s1208_s5 = inlined_call_operand.vmem [shape: f32[1,16], index: 5, kind: input, shape index: {}]   ;;  %s1209_s6 = inlined_call_operand.vmem [shape: bf16[4,8,16], index: 6, kind: input, shape index: {}]   ;;  %s1210_s7 = inlined_call_operand.vmem [shape: bf16[16,128], index: 7, kind: input, shape index: {}]   ;;  %s1211_s8 = inlined_call_operand.vmem [shape: f32[1,128], index: 8, kind: input, shape index: {}]   ;;  %s1212_s9 = inlined_call_operand.hbm [shape: f32[4,8,128], index: 9, kind: output, shape index: {}]  }
   0x1   :  { %16 = vsyncpa [#allocation3 + $0x1], 0  ;;  %s1062_s30 = smov 0   ;;  %s1064_s10 = smov 0  }
   0x2   :  { %s1066_s11 = smov 0   ;;  %s1068_s12 = smov 0  }
   0x3 LB: > { %s1083_s13 = sadd.s32 4294967295, %s1007_s12   ;;  %s814_s14 = sadd.s32 4294967294, %s1007_s12   ;;  %s1007_s12 = sphi %s1068_s12, %s1218_s12   ;;  %s1003_s11 = sphi %s1066_s11, %s1217_s11   ;;  %s999_s10 = sphi %s1064_s10, %s1216_s10   ;;  %s995_s30 = sphi %s1062_s30, %s1215_s30  }
   0x4   : > { %s1087_s15 = sadd.s32 1, %s1007_s12   ;;  %s233_s16 = sadd.s32 1, %s1003_s11 }
   0x5   : > { %s230_s17 = ssub.s32 %s1007_s12, %s1087_s15  ;;  %p243_p0 = scmp.ne.s32.totalorder %s1003_s11, %s999_s10 }
   0x6   : > { %p231_p1 = scmp.eq.s32.totalorder %s230_s17, 0  ;;  %p244_p2 = scmp.eq.s32.totalorder %s1083_s13, 3 }
   0x7   : > { %p249_p3 = scmp.ne.s32.totalorder %s999_s10, %s995_s30  ;;  %p250_p4 = scmp.eq.s32.totalorder %s814_s14, 3 }
   0x8   : > { %s1098_s18 = scalar_select %p231_p1, %s1003_s11, %s233_s16  }
   0x9   : > { %p1100_p5 = por %p244_p2, %p243_p0  ;;  %p1104_p6 = por %p250_p4, %p249_p3 }
   0xa   : > { %p817_p7 = scmp.ge.s32.totalorder %s1007_s12, 1  ;;  %p309_p8 = scmp.lt.s32.totalorder %s1007_s12, 5 }
   0xc   : > { %p310_p9 = pnand %p817_p7, %p309_p8 }
   0xd   : > { %p354_p10 = scmp.lt.s32.totalorder (!%p310_p9), %s1083_s13, 3  ;;  %v1009_v0 = vmov (!%p310_p9), 0.0   ;;  %vm1010_vm0 = vmmov (!%p310_p9), 0   ;;  %vm384_vm1 = vcmask (!%p310_p9), 130048   ;;  %v430_v3 = vld [vmem:[%s1205_s2] sm:$0xf] (!%p310_p9) }
   0xe   : > { %313 = sbr.rel (%p310_p9) target bundleno = 1663 (0x67f), region = 56  ;;  %857 = vmatprep.subr.bf16.mxu0 (!%p310_p9), %v1009_v0  ;;  %859 = vmatprep.mubr.msk.bf16.mxu0 (!%p310_p9), %vm1010_vm0, %v1009_v0  ;;  %vm442_vm2 = vcmask (!%p310_p9), 1043456   ;;  %vm438_vm3 = vcmask (!%p310_p9), 64512   ;;  %v938_v10 = vld [vmem:[%s1207_s4] sm:$0xff] (!%p310_p9)   ;;  %v939_v11 = vld [vmem:[%s1207_s4 + $0x8] sm:$0xff] (!%p310_p9)   ;;  %vm506_vm4 = vcmask (!%p310_p9), 261120  }
   0xf   : > { %863 = vmatprep.subr.bf16.mxu1 (!%p310_p9), %v1009_v0  ;;  %865 = vmatprep.mubr.msk.bf16.mxu1 (!%p310_p9), %vm1010_vm0, %v1009_v0  ;;  %v444_v4 = vsel (!%p310_p9), %vm442_vm2, %v430_v3, 0  ;;  %v827_v12 = vld [vmem:[%s1206_s3] ss:$0 sm:$0xff] (!%p310_p9)  ;;  %s351_s24 = sand.u32 (!%p310_p9), 1, %s999_s10   ;;  %s839_s26 = sshll.u32 (!%p310_p9), %s1083_s13, 7 }
  0x10   : > { %864 = vmatpush3.bf16.msra.mxu1 (!%p310_p9), %v444_v4  ;;  %v832_v27 = vld [vmem:[%s1208_s5] ss:$0 sm:$0xff] (!%p310_p9)  ;;  %s718_s17 = scalar_lea.sflag (!%p310_p9), [#allocation3], %s351_s24 }
  0x11   : > { %877 = vmatprep.subr.bf16.mxu1 (!%p310_p9), %v1009_v0  ;;  %v940_v38 = vld [vmem:[%s1210_s7] sm:$0xff] (!%p310_p9)  }
  0x12   : > { %v835_v44 = vld [vmem:[%s1211_s8] ss:$0 sm:$0xff] (!%p310_p9) }
  0x15   : > { %s1113_s21 = scalar_select %p354_p10, %s1083_s13, 3 }
  0x16   : > { %s1011_s13 = smov [#allocation2]  }
  0x17   : > { %s842_s22 = sshll.u32 %s1113_s21, 3 }
  0x18   : > { %s358_s25 = scalar_lea.vmem %s1203_s0, %s842_s22  ;;  %s363_s28 = scalar_lea.vmem %s1204_s1, %s842_s22 }
  0x19   : > { %v936_v1 = vld [vmem:[%s363_s28] sm:$0xff]   ;;  %s823_s28 = sshll.u32 %s1113_s21, 2  ;;  %s949_s21 = sshll.u32 %s1011_s13, 4  ;;  %s950_s21 = int_to_ptr.vmem [resolvable:$false] %s949_s21 }
  0x1a   : > { %v937_v2 = vld [vmem:[%s358_s25] sm:$0xff]   ;;  %858 = vmatpush3.bf16.msra.mxu0 %v936_v1  ;;  %s367_s16 = scalar_lea.vmem %s1209_s6, %s823_s28  ;;  %s818_s25 = sshll.u32 %s351_s24, 3 }
  0x1b   : > { %869 = vmatprep.subr.bf16.mxu0 %v1009_v0  ;;  %v602_v37 = vld [vmem:[%s367_s16] sm:$0xf]  ;;  %s353_s27 = scalar_lea.vmem [#allocation2], %s818_s25  ;;  %s1161_s16 = scalar_lea.hbm %s1212_s9, %s839_s26 }
  0x1c   : > { %s731_s28 = sshll.u32 %s353_s27, 4  ;;  %s951_s23 = scalar_lea.vmem %s950_s21, 256  ;;  %s1163_s28 = int_to_ptr.vmem [resolvable:$true] %s731_s28 }
  0x1d   : > { %860 = vmatmul.mubr.msk.bf16.vlgmr.msra.gmra.mrb[0].mxu0 %vm384_vm1, %v937_v2  ;;  %s945_s22 = scalar_lea.vmem %s1163_s28, 128  ;;  %p952_p0 = scmp.lt.s32.totalorder %s1163_s28, %s950_s21 }
  0x1e   : > { %873 = vmatprep.mubr.msk.bf16.mxu0 %vm1010_vm0, %v1009_v0  ;;  %870 = vmatpush3.bf16.msra.mxu0 %v938_v10  ;;  %p946_p11 = scmp.ne.s32.totalorder %s1163_s28, %s945_s22  ;;  %p953_p1 = scmp.lt.s32.totalorder %s951_s23, %s945_s22 }
  0x1f   : > { %871 = vmatprep.subr.bf16.mxu0 %v1009_v0 }
  0x20   : > { %p947_p12 = pnand %p946_p11, %p1100_p5  ;;  %p954_p2 = por %p953_p1, %p952_p0 }
  0x22   : > { %872 = vmatpush3.bf16.msra.mxu0 %v939_v11  ;;  %p948_p13 = pneg %p947_p12 }
  0x23   : > { %883 = vmatprep.subr.bf16.mxu0 %v1009_v0 }
  0x24   : > { %p955_p3 = pnand %p954_p2, %p948_p13 }
  0xf0   : > { %v422_v5 = vpop.f32.mrb[0].mxu0 }
  0xf1   : > { %v861_v6 = vpop.f32.mrb[1].mxu0 }
  0xf2   : > { %v425_v7 = vpop.f32.mrb[2].mxu0 }
  0xf3   : > { %v429_v8 = vpack.c.bf16 %v425_v7, %v422_v5  ;;  %v862_v9 = vpop.f32.mrb[3].mxu0 }
  0xf5   : > { %866 = vmatmul.mubr.msk.bf16.vlgmr.msra.gmra.mrb[0].mxu1 %vm438_vm3, %v429_v8 }
  0xf6   : > { %879 = vmatprep.mubr.msk.bf16.mxu1 %vm1010_vm0, %v1009_v0 }
 0x1c8   : > { %v480_v13 = vpop.f32.mrb[0].mxu1 }
 0x1c9   : > { %v481_v14 = vadd.f32 %v827_v12, %v480_v13  ;;  %v867_v15 = vpop.f32.mrb[1].mxu1 }
 0x1ca   : > { %v483_v16 = vpop.f32.mrb[2].mxu1 }
 0x1cb   : > { %v484_v17 = vadd.f32 %v827_v12, %v483_v16  ;;  %v868_v18 = vpop.f32.mrb[3].mxu1  ;;  %v487_v19 = vmax.f32 %v481_v14, 0.0 }
 0x1cd   : > { %v488_v20 = vmax.f32 %v484_v17, 0.0 }
 0x1cf   : > { %v489_v21 = vpack.c.bf16 %v488_v20, %v487_v19 }
 0x1d1   : > { %874 = vmatmul.mubr.msk.bf16.vlgmr.msra.gmra.mrb[4].mxu0 %vm506_vm4, %v489_v21 }
 0x1d2   : > { %885 = vmatprep.mubr.msk.bf16.mxu0 %vm1010_vm0, %v1009_v0 }
 0x2a4   : > { %v544_v22 = vpop.f32.mrb[4].mxu0 }
 0x2a5   : > { %v875_v23 = vpop.f32.mrb[5].mxu0 }
 0x2a6   : > { %v547_v24 = vpop.f32.mrb[6].mxu0 }
 0x2a7   : > { %v551_v25 = vpack.c.bf16 %v547_v24, %v544_v22  ;;  %v876_v26 = vpop.f32.mrb[7].mxu0 }
 0x2a9   : > { %878 = vmatpush3.bf16.msra.mxu1 %v551_v25 }
 0x2aa   : > { %889 = vmatprep.subr.bf16.mxu1 %v1009_v0 }
 0x2ac   : > { %880 = vmatmul.mubr.msk.bf16.vlgmr.msra.gmra.mrb[4].mxu1 %vm384_vm1, %v937_v2 }
 0x2ad   : > { %891 = vmatprep.mubr.msk.bf16.mxu1 %vm1010_vm0, %v1009_v0  ;;  %890 = vmatpush3.bf16.msra.mxu1 %v940_v38 }
 0x37f   : > { %v593_v28 = vpop.f32.mrb[4].mxu1 }
 0x380   : > { %v594_v29 = vadd.f32 %v832_v27, %v593_v28  ;;  %v881_v30 = vpop.f32.mrb[5].mxu1 }
 0x381   : > { %v596_v31 = vpop.f32.mrb[6].mxu1 }
 0x382   : > { %v597_v32 = vadd.f32 %v832_v27, %v596_v31  ;;  %v882_v33 = vpop.f32.mrb[7].mxu1  ;;  %v600_v34 = vmax.f32 %v594_v29, 0.0 }
 0x384   : > { %v601_v35 = vmax.f32 %v597_v32, 0.0 }
 0x386   : > { %v603_v36 = vpack.c.bf16 %v601_v35, %v600_v34 }
 0x388   : > { %884 = vmatpush3.bf16.msra.mxu0 %v603_v36 }
 0x38b   : > { %886 = vmatmul.mubr.msk.bf16.vlgmr.msra.gmra.mrb[8].mxu0 %vm384_vm1, %v602_v37 }
 0x45e   : > { %v641_v39 = vpop.f32.mrb[8].mxu0 }
 0x45f   : > { %v647_v40 = vpack.c.bf16 %v641_v39, %v641_v39  ;;  %v887_v41 = vpop.f32.mrb[9].mxu0 }
 0x460   : > { %v644_v42 = vpop.f32.mrb[10].mxu0 }
 0x461   : > { %892 = vmatmul.mubr.msk.bf16.vlgmr.msra.gmra.mrb[8].mxu1 %vm384_vm1, %v647_v40  ;;  %v888_v43 = vpop.f32.mrb[11].mxu0 }
 0x534   : > { %v700_v45 = vpop.f32.mrb[8].mxu1 }
 0x535   : > { %v701_v46 = vadd.f32 %v835_v44, %v700_v45  ;;  %v893_v47 = vpop.f32.mrb[9].mxu1 }
 0x536   : > { %v703_v48 = vpop.f32.mrb[10].mxu1 }
 0x537   : > { %706 = vmax.xlane.f32.xlu0 %v701_v46  ;;  %v894_v49 = vpop.f32.mrb[11].mxu1 }
 0x5c4   : > { %v707_v50 = vpop.xlane.xlu0 %706 }
 0x5c5   : > { %v708_v51 = vsub.f32 %v701_v46, %v707_v50 }
 0x5c7   : > { %v709_v52 = vmul.f32 1.442695, %v708_v51 }
 0x5c9   : > { %941 = vpow2.f32 %v709_v52 }
 0x5d3   : > { %v942_v53 = vpop.eup %941 }
 0x5d4   : > { %711 = vadd.xlane.f32.xlu0 %v942_v53 }
 0x661   : > { %v712_v54 = vpop.xlane.xlu0 %711 }
 0x662   : > { %943 = vlog2.f32 %v712_v54 }
 0x66c   : > { %v944_v55 = vpop.eup %943 }
 0x66d   : > { %v714_v56 = vmul.f32 0.6931472, %v944_v55 }
 0x66f   : > { %v715_v57 = vsub.f32 %v708_v51, %v714_v56 }
 0x671   : > { %716 = vst [vmem:[%s353_s27] sm:$0xff] %v715_v57 }
 0x672   : > { %958 = shalt.err (!%p955_p3)
}
 0x673   : > { %s959_s24 = scalar_lea.hbm %s1161_s16, 128  ;;  %s963_s27 = scalar_lea.hbm %s1212_s9, 512 }
 0x674   : > { %p960_p4 = scmp.ne.s32.totalorder %s1161_s16, %s959_s24  ;;  %p964_p9 = scmp.lt.u32.totalorder %s1161_s16, %s1212_s9 }
 0x675   : > { %p965_p10 = scmp.lt.u32.totalorder %s963_s27, %s959_s24  ;;  %p967_p12 = scmp.lt.u32.totalorder %s959_s24, %s1161_s16 }
 0x676   : > { %p961_p7 = pnand %p960_p4, %p1100_p5 }
 0x677   : > { %p966_p11 = por %p965_p10, %p964_p9 }
 0x678   : > { %p962_p8 = pneg %p961_p7 }
 0x679   : > { %p968_p13 = por %p967_p12, %p966_p11 }
 0x67b   : > { %p969_p0 = pnand %p968_p13, %p962_p8 }
 0x67d   : > { %972 = shalt.err (!%p969_p0)
}
 0x67e   : > { %895 = dma.vmem_to_hbm [thread:$0]  (%p1100_p5), %s1163_s28, 128, %s1161_s16, %s718_s17  }
 0x67f PF: > { %p901_p1 = scmp.ge.s32.totalorder %s1007_s12, 2  ;;  %s743_s22 = sand.u32 1, %s995_s30  }
 0x680   : > { %s744_s13 = scalar_lea.sflag [#allocation3], %s743_s22 }
 0x681   : > { %p898_p2 = pnand %p901_p1, %p1104_p6 }
 0x683   : > { %990 = dma.done.wait (!%p898_p2), %s744_s13, 128  }
 0x684   : > { %992 = vsyncadd (!%p898_p2), %s744_s13, 4294967168  ;;  %p19_p3 = scmp.ge.s32.totalorder %s1087_s15, 6   ;;  %s1215_s30 = smov %s999_s10 }
 0x685   : > { %s1216_s10 = smov %s1003_s11  ;;  %s1217_s11 = smov %s1098_s18 }
 0x686   : > { %s1218_s12 = smov %s1087_s15  ;;  %21 = sbr.rel (!%p19_p3) target bundleno = 3 (0x3), region = 97 }
 0x68d   :  { %749 = vsyncpa [#allocation3], 1 }
 0x68e   :  { %751 = vsyncpa [#allocation3 + $0x1], 1 }

</bundles_post_ra>
